<compile_context>
chip_gen: v7x
topology: tpu7x:2x2x1
jax: 0.10.0
libtpu: 0.0.40
codegen_flags: <defaults>
</compile_context>

<pallas_src>
import functools

import jax
import jax.numpy as jnp
from jax.experimental import pallas as pl
from jax.experimental.pallas import tpu as pltpu

LANE = 128
ROW_ALIGN = 16          # bf16 packs 2 rows per sublane -> keep batch tiles %16

H1 = 128                # fc1 output width (already lane-dense)
H2 = 64                 # fc2 logical output width
H2_PAD = 128            # fc2 padded width
OUT_DIM = 10            # fc3 logical output width
OUT_PAD = 128           # fc3 padded width (lane-dense, unmasked stores)


def _round_up(n, m):
    return ((n + m - 1) // m) * m


def mlp_kernel(x_ref, w1_ref, w2_ref, w3_ref, b_ref, o_ref):
    # x_ref: (TB, IN_DIM) f32  -> cast to bf16 in-kernel (MXU-native, no wrapper pass)
    # w*_ref: bf16 weights (VMEM-resident across all grid steps)
    # b_ref:  (3, 128) f32 stacked biases
    # o_ref:  (TB, OUT_PAD) bf16
    x = x_ref[...].astype(jnp.bfloat16)

    b1 = b_ref[0:1, :]
    b2 = b_ref[1:2, :]
    b3 = b_ref[2:3, :]

    # fc1 + ReLU
    h1 = jnp.dot(x, w1_ref[...], preferred_element_type=jnp.float32) + b1
    h1 = jnp.maximum(h1, 0.0).astype(jnp.bfloat16)
    # fc2 + ReLU (padded 64 -> 128; padded lanes stay exactly 0 through ReLU)
    h2 = jnp.dot(h1, w2_ref[...], preferred_element_type=jnp.float32) + b2
    h2 = jnp.maximum(h2, 0.0).astype(jnp.bfloat16)
    # fc3 (padded 10 -> 128; padded lanes sliced off in the wrapper)
    o = jnp.dot(h2, w3_ref[...], preferred_element_type=jnp.float32) + b3
    o_ref[...] = o.astype(o_ref.dtype)


def prepare_params(w1, b1, w2, b2, w3, b3):
    """Pad + cast parameters ONCE (outside the per-call path).

    Weights are expected in (in_features, out_features) layout, i.e. the
    transpose of PyTorch's nn.Linear .weight:
      w1: (input_dim, 128), w2: (128, 64), w3: (64, 10)
    """
    in_dim = w1.shape[0]

    w1p = w1.astype(jnp.bfloat16)                                          # (in_dim, 128)
    w2p = jnp.zeros((H1, H2_PAD), jnp.bfloat16).at[:, :H2].set(w2.astype(jnp.bfloat16))
    w3p = jnp.zeros((H2_PAD, OUT_PAD), jnp.bfloat16).at[:H2, :OUT_DIM].set(w3.astype(jnp.bfloat16))

    b_all = jnp.zeros((3, OUT_PAD), jnp.float32)
    b_all = b_all.at[0, :H1].set(b1.astype(jnp.float32))
    b_all = b_all.at[1, :H2].set(b2.astype(jnp.float32))
    b_all = b_all.at[2, :OUT_DIM].set(b3.astype(jnp.float32))

    del in_dim
    return w1p, w2p, w3p, b_all


@functools.partial(jax.jit, static_argnames=("block_batch",))
def ann_forward(x, w1p, w2p, w3p, b_all, *, block_batch=1024):
    """Pallas implementation of ANN.forward.

    x: (B, ...) -> flattened to (B, input_dim) f32; returns (B, 10) f32 logits.
    Parameters must come from prepare_params().
    """
    B = x.shape[0]
    x2 = x.reshape(B, -1)
    in_dim = x2.shape[1]

    # Batch tile: capped, 16-row aligned. If the whole batch fits in one tile,
    # halve the tile (16-row floor) so the "parallel" grid axis has >= 2 steps
    # and both TensorCores engage on v7x.
    tb = min(block_batch, _round_up(B, ROW_ALIGN))
    while tb > ROW_ALIGN and pl.cdiv(B, tb) < 2:
        tb = _round_up(tb // 2, ROW_ALIGN)

    grid = (pl.cdiv(B, tb),)

    out = pl.pallas_call(
        mlp_kernel,
        out_shape=jax.ShapeDtypeStruct((B, OUT_PAD), jnp.bfloat16),
        grid=grid,
        in_specs=[
            pl.BlockSpec((tb, in_dim), lambda i: (i, 0)),         # x: tiled over batch (f32, cast in-kernel)
            pl.BlockSpec((in_dim, H1), lambda i: (0, 0)),         # w1: VMEM-resident
            pl.BlockSpec((H1, H2_PAD), lambda i: (0, 0)),         # w2
            pl.BlockSpec((H2_PAD, OUT_PAD), lambda i: (0, 0)),    # w3
            pl.BlockSpec((3, OUT_PAD), lambda i: (0, 0)),         # stacked biases
        ],
        out_specs=pl.BlockSpec((tb, OUT_PAD), lambda i: (i, 0)),
        compiler_params=pltpu.CompilerParams(
            dimension_semantics=("parallel",),                    # 2 TCs on v7x
            vmem_limit_bytes=32 * 1024 * 1024,                    # safe on v5e/v6e/v7x
        ),
    )(x2, w1p, w2p, w3p, b_all)

    # Slice off padded lanes; upcast tiny (B, 10) slab to f32 logits.
    return out[:, :OUT_DIM].astype(jnp.float32)


def init_params(key, input_dim=1296):
    """Deterministic parameter init (uniform +-1/sqrt(fan_in), nn.Linear-like shapes)."""
    k1, k2, k3, k4, k5, k6 = jax.random.split(key, 6)

    def linear(kw, kb, fan_in, fan_out):
        bound = 1.0 / jnp.sqrt(fan_in)
        # stored as (in, out) == transpose of PyTorch's (out, in) weight
        w = jax.random.uniform(kw, (fan_in, fan_out), jnp.float32, -bound, bound)
        b = jax.random.uniform(kb, (fan_out,), jnp.float32, -bound, bound)
        return w, b

    w1, b1 = linear(k1, k2, input_dim, 128)
    w2, b2 = linear(k3, k4, 128, 64)
    w3, b3 = linear(k5, k6, 64, 10)
    return w1, b1, w2, b2, w3, b3


def _reference(x, w1, b1, w2, b2, w3, b3):
    r = x.reshape(x.shape[0], -1)
    r = jnp.maximum(r @ w1 + b1, 0.0)
    r = jnp.maximum(r @ w2 + b2, 0.0)
    return r @ w3 + b3


if __name__ == "__main__":
    key = jax.random.PRNGKey(0)
    kx, kx2, kp = jax.random.split(key, 3)

    INPUT_DIM = 1296
    w1, b1, w2, b2, w3, b3 = init_params(kp, input_dim=INPUT_DIM)
    prepared = prepare_params(w1, b1, w2, b2, w3, b3)

    # Small batch (single, ragged grid step)
    B = 2
    x = jax.random.normal(kx, (B, INPUT_DIM), jnp.float32)
    out = jax.block_until_ready(ann_forward(x, *prepared))
    ref = _reference(x, w1, b1, w2, b2, w3, b3)
    assert out.shape == (B, 10)
    assert jnp.allclose(out, ref, atol=5e-2, rtol=5e-2), (
        f"max abs err {float(jnp.max(jnp.abs(out - ref)))}")

    # Ragged, multi-step grid (exercises OOB masking + 2-step parallel axis)
    B2 = 37
    x2 = jax.random.normal(kx2, (B2, INPUT_DIM), jnp.float32)
    out2 = jax.block_until_ready(ann_forward(x2, *prepared))
    ref2 = _reference(x2, w1, b1, w2, b2, w3, b3)
    assert out2.shape == (B2, 10)
    assert jnp.allclose(out2, ref2, atol=5e-2, rtol=5e-2), (
        f"max abs err {float(jnp.max(jnp.abs(out2 - ref2)))}")

    print("KERNEL_OK")
</pallas_src>

<mosaic_0001>
module attributes {stable_mosaic.version = 11 : i64} {
  func.func @mlp_kernel(%arg0: i32, %arg1: memref<16x1296xf32, #tpu.memory_space<vmem>>, %arg2: memref<1296x128xbf16, #tpu.memory_space<vmem>>, %arg3: memref<128x128xbf16, #tpu.memory_space<vmem>>, %arg4: memref<128x128xbf16, #tpu.memory_space<vmem>>, %arg5: memref<3x128xf32, #tpu.memory_space<vmem>>, %arg6: memref<16x128xbf16, #tpu.memory_space<vmem>>) attributes {dimension_semantics = [#tpu.dimension_semantics<parallel>], iteration_bounds = array<i64: 1>, scalar_prefetch = 0 : i64, scratch_operands = 0 : i64, tpu.core_type = #tpu.core_type<tc>, window_params = [{transform_indices = @transform_0, window_bounds = array<i64: 16, 1296>}, {pipeline_mode = #tpu.pipeline_mode<synchronous>, transform_indices = @transform_1, window_bounds = array<i64: 1296, 128>}, {pipeline_mode = #tpu.pipeline_mode<synchronous>, transform_indices = @transform_2, window_bounds = array<i64: 128, 128>}, {pipeline_mode = #tpu.pipeline_mode<synchronous>, transform_indices = @transform_3, window_bounds = array<i64: 128, 128>}, {pipeline_mode = #tpu.pipeline_mode<synchronous>, transform_indices = @transform_4, window_bounds = array<i64: 3, 128>}, {transform_indices = @transform_5, window_bounds = array<i64: 16, 128>}]} {
    %c0 = arith.constant 0 : index
    %c0_0 = arith.constant 0 : index
    %0 = vector.load %arg1[%c0, %c0_0] : memref<16x1296xf32, #tpu.memory_space<vmem>>, vector<16x1296xf32>
    %1 = arith.truncf %0 : vector<16x1296xf32> to vector<16x1296xbf16>
    %c0_1 = arith.constant 0 : index
    %c0_2 = arith.constant 0 : index
    %2 = vector.load %arg5[%c0_1, %c0_2] : memref<3x128xf32, #tpu.memory_space<vmem>>, vector<1x128xf32>
    %c1 = arith.constant 1 : index
    %c0_3 = arith.constant 0 : index
    %3 = vector.load %arg5[%c1, %c0_3] : memref<3x128xf32, #tpu.memory_space<vmem>>, vector<1x128xf32>
    %c2 = arith.constant 2 : index
    %c0_4 = arith.constant 0 : index
    %4 = vector.load %arg5[%c2, %c0_4] : memref<3x128xf32, #tpu.memory_space<vmem>>, vector<1x128xf32>
    %c0_5 = arith.constant 0 : index
    %c0_6 = arith.constant 0 : index
    %5 = vector.load %arg2[%c0_5, %c0_6] : memref<1296x128xbf16, #tpu.memory_space<vmem>>, vector<1296x128xbf16>
    %cst = arith.constant dense<0.000000e+00> : vector<16x128xf32>
    %6 = tpu.matmul %1, %5, %cst {dimension_numbers = #tpu.dot_dimension_numbers<[1], [0], [0], [1], [0, 0, 1, 1], [], []>} : vector<16x1296xbf16>, vector<1296x128xbf16>, vector<16x128xf32> -> vector<16x128xf32>
    %7 = vector.broadcast %2 : vector<1x128xf32> to vector<16x128xf32>
    %8 = arith.addf %6, %7 : vector<16x128xf32>
    %cst_7 = arith.constant 0.000000e+00 : f32
    %9 = vector.broadcast %cst_7 : f32 to vector<16x128xf32>
    %10 = arith.maximumf %8, %9 : vector<16x128xf32>
    %11 = arith.truncf %10 : vector<16x128xf32> to vector<16x128xbf16>
    %c0_8 = arith.constant 0 : index
    %c0_9 = arith.constant 0 : index
    %12 = vector.load %arg3[%c0_8, %c0_9] : memref<128x128xbf16, #tpu.memory_space<vmem>>, vector<128x128xbf16>
    %cst_10 = arith.constant dense<0.000000e+00> : vector<16x128xf32>
    %13 = tpu.matmul %11, %12, %cst_10 {dimension_numbers = #tpu.dot_dimension_numbers<[1], [0], [0], [1], [0, 0, 1, 1], [], []>} : vector<16x128xbf16>, vector<128x128xbf16>, vector<16x128xf32> -> vector<16x128xf32>
    %14 = vector.broadcast %3 : vector<1x128xf32> to vector<16x128xf32>
    %15 = arith.addf %13, %14 : vector<16x128xf32>
    %cst_11 = arith.constant 0.000000e+00 : f32
    %16 = vector.broadcast %cst_11 : f32 to vector<16x128xf32>
    %17 = arith.maximumf %15, %16 : vector<16x128xf32>
    %18 = arith.truncf %17 : vector<16x128xf32> to vector<16x128xbf16>
    %c0_12 = arith.constant 0 : index
    %c0_13 = arith.constant 0 : index
    %19 = vector.load %arg4[%c0_12, %c0_13] : memref<128x128xbf16, #tpu.memory_space<vmem>>, vector<128x128xbf16>
    %cst_14 = arith.constant dense<0.000000e+00> : vector<16x128xf32>
    %20 = tpu.matmul %18, %19, %cst_14 {dimension_numbers = #tpu.dot_dimension_numbers<[1], [0], [0], [1], [0, 0, 1, 1], [], []>} : vector<16x128xbf16>, vector<128x128xbf16>, vector<16x128xf32> -> vector<16x128xf32>
    %21 = vector.broadcast %4 : vector<1x128xf32> to vector<16x128xf32>
    %22 = arith.addf %20, %21 : vector<16x128xf32>
    %23 = arith.truncf %22 : vector<16x128xf32> to vector<16x128xbf16>
    %c0_15 = arith.constant 0 : index
    %c0_16 = arith.constant 0 : index
    %24 = vector.load %arg6[%c0_15, %c0_16] : memref<16x128xbf16, #tpu.memory_space<vmem>>, vector<16x128xbf16>
    tpu.vector_store %arg6[%c0_15, %c0_16], %23 {strides = array<i32>} : memref<16x128xbf16, #tpu.memory_space<vmem>>, vector<16x128xbf16>,
    return
  }
  func.func @transform_0(%arg0: i32) -> (i32, i32) {
    %c0_i32 = arith.constant 0 : i32
    %c0_i32_0 = arith.constant 0 : i32
    return %arg0, %c0_i32 : i32, i32
  }
  func.func @transform_1(%arg0: i32) -> (i32, i32) {
    %c0_i32 = arith.constant 0 : i32
    %c0_i32_0 = arith.constant 0 : i32
    %c0_i32_1 = arith.constant 0 : i32
    return %c0_i32, %c0_i32_0 : i32, i32
  }
  func.func @transform_2(%arg0: i32) -> (i32, i32) {
    %c0_i32 = arith.constant 0 : i32
    %c0_i32_0 = arith.constant 0 : i32
    %c0_i32_1 = arith.constant 0 : i32
    return %c0_i32, %c0_i32_0 : i32, i32
  }
  func.func @transform_3(%arg0: i32) -> (i32, i32) {
    %c0_i32 = arith.constant 0 : i32
    %c0_i32_0 = arith.constant 0 : i32
    %c0_i32_1 = arith.constant 0 : i32
    return %c0_i32, %c0_i32_0 : i32, i32
  }
  func.func @transform_4(%arg0: i32) -> (i32, i32) {
    %c0_i32 = arith.constant 0 : i32
    %c0_i32_0 = arith.constant 0 : i32
    %c0_i32_1 = arith.constant 0 : i32
    return %c0_i32, %c0_i32_0 : i32, i32
  }
  func.func @transform_5(%arg0: i32) -> (i32, i32) {
    %c0_i32 = arith.constant 0 : i32
    %c0_i32_0 = arith.constant 0 : i32
    return %arg0, %c0_i32 : i32, i32
  }
}

</mosaic_0001>

<bundles_post_ra>
// kernel: ann_forward.1
= control target key start
LH: loop header
LB: loop body
LE: loop exit
PB: predicated region body
PF: predicated region fallthrough
CT: control target
= control target key end

     0   :  { %10 = vsyncpa [#allocation3], 0  ;;  %s2302_s0 = inlined_call_operand.hbm [shape: f32[2,1296], index: 0, kind: input, shape index: {}]   ;;  %s2303_s1 = inlined_call_operand.hbm [shape: bf16[1296,128], index: 1, kind: input, shape index: {}]   ;;  %s2304_s2 = inlined_call_operand.hbm [shape: bf16[128,128], index: 2, kind: input, shape index: {}]   ;;  %s2305_s3 = inlined_call_operand.hbm [shape: bf16[128,128], index: 3, kind: input, shape index: {}]   ;;  %s2306_s4 = inlined_call_operand.vmem [shape: f32[3,128], index: 4, kind: input, shape index: {}]   ;;  %s2307_s5 = inlined_call_operand.vmem [shape: bf16[2,128], index: 5, kind: output, shape index: {}]  }
   0x1   :  { %11 = vsyncpa [#allocation5], 0 }
   0x2   :  { %12 = vsyncpa [#allocation8], 0 }
   0x3   :  { %17 = vsyncadd [#allocation3], 2464  ;;  %s2130_s18 = smov [#allocation4]   ;;  %s2036_s22 = scalar_lea.hbm %s2303_s1, 10368 }
   0x4   :  { %s30_s19 = sshll.u32 %s2130_s18, 4  ;;  %p2037_p0 = scmp.ne.s32.totalorder %s2303_s1, %s2036_s22  ;;  %s31_s19 = int_to_ptr.vmem [resolvable:$true] %s30_s19 }
   0x5   :  { %p2040_p1 = scmp.lt.u32.totalorder %s2036_s22, %s2303_s1 }
   0x7   :  { %p2042_p2 = pnand %p2040_p1, %p2037_p0 }
   0x9   :  { %2045 = shalt.err (!%p2042_p2)
}
   0xa   :  { %s2046_s27 = scalar_lea.vmem %s31_s19, 10368  ;;  %p2051_p4 = scmp.lt.s32.totalorder %s31_s19, %s31_s19 }
   0xb   :  { %p2047_p3 = scmp.ne.s32.totalorder %s31_s19, %s2046_s27  ;;  %p2052_p5 = scmp.lt.s32.totalorder %s2046_s27, %s2046_s27 }
   0xd   :  { %p2053_p6 = por %p2052_p5, %p2051_p4 }
   0xf   :  { %p2054_p7 = pnand %p2053_p6, %p2047_p3 }
  0x11   :  { %2057 = shalt.err (!%p2054_p7)
}
  0x12   :  { %s2131_s28 = smov 64   ;;  %s2132_s29 = smov 4  }
  0x13   :  { %36 = dma.hbm_to_vmem [thread:$0]  %s2303_s1, 10368, %s31_s19, [#allocation5], %s2131_s28, %s2131_s28, %s2132_s29  }
  0x14   :  { %s2133_s7 = smov [#allocation2]   ;;  %s2058_s11 = scalar_lea.hbm %s2302_s0, 352 }
  0x15   :  { %s18_s8 = sshll.u32 %s2133_s7, 4  ;;  %p2059_p8 = scmp.ne.s32.totalorder %s2302_s0, %s2058_s11  ;;  %s19_s8 = int_to_ptr.vmem [resolvable:$true] %s18_s8 }
  0x16   :  { %p2062_p9 = scmp.lt.u32.totalorder %s2058_s11, %s2302_s0 }
  0x18   :  { %p2064_p10 = pnand %p2062_p9, %p2059_p8 }
  0x1a   :  { %2067 = shalt.err (!%p2064_p10)
}
  0x1b   :  { %s2068_s16 = scalar_lea.vmem %s19_s8, 352  ;;  %s2072_s1 = scalar_lea.vmem %s19_s8, 2816 }
  0x1c   :  { %p2069_p11 = scmp.ne.s32.totalorder %s19_s8, %s2068_s16  ;;  %p2073_p12 = scmp.lt.s32.totalorder %s19_s8, %s19_s8 }
  0x1d   :  { %p2074_p13 = scmp.lt.s32.totalorder %s2072_s1, %s2068_s16 }
  0x1f   :  { %p2075_p0 = por %p2074_p13, %p2073_p12 }
  0x21   :  { %p2076_p1 = pnand %p2075_p0, %p2069_p11 }
  0x23   :  { %2079 = shalt.err (!%p2076_p1)
}
  0x24   :  { %s2134_s17 = smov 352   ;;  %s2135_s18 = smov 22  }
  0x25   :  { %24 = dma.hbm_to_vmem [thread:$0]  %s2302_s0, 352, %s19_s8, [#allocation3], %s2134_s17, %s2134_s17, %s2135_s18  }
  0x26   :  { %s2136_s21 = smov [#allocation6]   ;;  %s2137_s23 = smov [#allocation7]  }
  0x27   :  { %s42_s22 = sshll.u32 %s2136_s21, 4  ;;  %s54_s24 = sshll.u32 %s2137_s23, 4  ;;  %s43_s22 = int_to_ptr.vmem [resolvable:$true] %s42_s22  ;;  %s2199_s24 = int_to_ptr.vmem [resolvable:$true] %s54_s24 }
  0x28   :  { %s2080_s27 = scalar_lea.hbm %s2304_s2, 1024 }
  0x29   :  { %p2081_p2 = scmp.ne.s32.totalorder %s2304_s2, %s2080_s27  ;;  %p2084_p3 = scmp.lt.u32.totalorder %s2080_s27, %s2304_s2 }
  0x2b   :  { %p2086_p4 = pnand %p2084_p3, %p2081_p2 }
  0x2d   :  { %2089 = shalt.err (!%p2086_p4)
}
  0x2e   :  { %s2090_s0 = scalar_lea.vmem %s43_s22, 1024  ;;  %p2095_p6 = scmp.lt.s32.totalorder %s43_s22, %s43_s22 }
  0x2f   :  { %p2091_p5 = scmp.ne.s32.totalorder %s43_s22, %s2090_s0  ;;  %p2096_p7 = scmp.lt.s32.totalorder %s2090_s0, %s2090_s0 }
  0x31   :  { %p2097_p8 = por %p2096_p7, %p2095_p6 }
  0x33   :  { %p2098_p9 = pnand %p2097_p8, %p2091_p5 }
  0x35   :  { %2101 = shalt.err (!%p2098_p9)
}
  0x36   :  { %48 = dma.hbm_to_vmem [thread:$0]  %s2304_s2, 1024, %s43_s22, [#allocation5], %s2131_s28, %s2131_s28, %s2132_s29  }
  0x37   :  { %s2102_s13 = scalar_lea.hbm %s2305_s3, 1024 }
  0x38   :  { %p2103_p10 = scmp.ne.s32.totalorder %s2305_s3, %s2102_s13  ;;  %p2106_p11 = scmp.lt.u32.totalorder %s2102_s13, %s2305_s3 }
  0x3a   :  { %p2108_p12 = pnand %p2106_p11, %p2103_p10 }
  0x3c   :  { %2111 = shalt.err (!%p2108_p12)
}
  0x3d   :  { %s2112_s17 = scalar_lea.vmem %s2199_s24, 1024  ;;  %p2117_p0 = scmp.lt.s32.totalorder %s2199_s24, %s2199_s24 }
  0x3e   :  { %p2113_p13 = scmp.ne.s32.totalorder %s2199_s24, %s2112_s17  ;;  %p2118_p1 = scmp.lt.s32.totalorder %s2112_s17, %s2112_s17 }
  0x40   :  { %p2119_p2 = por %p2118_p1, %p2117_p0 }
  0x42   :  { %p2120_p3 = pnand %p2119_p2, %p2113_p13 }
  0x44   :  { %2123 = shalt.err (!%p2120_p3)
}
  0x45   :  { %60 = dma.hbm_to_vmem [thread:$0]  %s2305_s3, 1024, %s2199_s24, [#allocation8], %s2131_s28, %s2131_s28, %s2132_s29  }
  0x46   :  { %2124 = dma.done.wait [#allocation3], 2816  }
  0x47   :  { %2125 = vsyncadd [#allocation3], 4294964480 }
  0x48   :  { %2126 = dma.done.wait [#allocation5], 11392  }
  0x49   :  { %2127 = vsyncadd [#allocation5], 4294955904 }
  0x4a   :  { %2128 = dma.done.wait [#allocation8], 1024  }
  0x4b   :  { %2129 = vsyncadd [#allocation8], 4294966272  ;;  %v1903_v0 = vld [vmem:[#allocation4 + $0x40] sm:$0xff]   ;;  %v1907_v4 = vld [vmem:[#allocation4 + $0x48] sm:$0xff]   ;;  %v2138_v24 = vmov 1983009808   ;;  %v131_v26 = vlaneseq }
  0x4c   :  { %v1904_v1 = vld [vmem:[#allocation4] sm:$0xff]   ;;  %1715 = vmatprep.subr.bf16.mxu0 %v1903_v0  ;;  %v1908_v5 = vld [vmem:[#allocation4 + $0x8] sm:$0xff]   ;;  %v1911_v8 = vld [vmem:[#allocation4 + $0x50] sm:$0xff]   ;;  %v129_v25 = vunpack.c.l.s4 %v2138_v24  ;;  %vm2140_vm0 = vmmov 0   ;;  %vm1026_vm1 = vcmask 130048  }
  0x4d   :  { %v1905_v2 = vld [vmem:[#allocation4 + $0xc0] sm:$0xff]   ;;  %1716 = vmatpush3.bf16.msra.mxu0 %v1904_v1  ;;  %v1909_v6 = vld [vmem:[#allocation4 + $0xc8] sm:$0xff]   ;;  %v1912_v9 = vld [vmem:[#allocation4 + $0x10] sm:$0xff]   ;;  %v2236_v32 = vshrl.u32 %v131_v26, 7 }
  0x4e   :  { %v1906_v3 = vld [vmem:[#allocation4 + $0x80] sm:$0xff]   ;;  %1737 = vmatprep.subr.bf16.mxu1 %v1905_v2  ;;  %1717 = vmatprep.subr.bf16.mxu0 %v1907_v4  ;;  %v1910_v7 = vld [vmem:[#allocation4 + $0x88] sm:$0xff]   ;;  %v1913_v10 = vld [vmem:[#allocation4 + $0xd0] sm:$0xff]   ;;  %v130_v31 = vunpack.c.0.s8 %v129_v25 }
  0x4f   :  { %1738 = vmatpush3.bf16.msra.mxu1 %v1906_v3  ;;  %v1914_v11 = vld [vmem:[#allocation4 + $0x90] sm:$0xff]   ;;  %v1915_v12 = vld [vmem:[#allocation4 + $0x58] sm:$0xff]   ;;  %v1919_v16 = vld [vmem:[#allocation4 + $0x60] sm:$0xff]  }
  0x50   :  { %1739 = vmatprep.subr.bf16.mxu1 %v1909_v6  ;;  %v1916_v13 = vld [vmem:[#allocation4 + $0x18] sm:$0xff]   ;;  %v1920_v17 = vld [vmem:[#allocation4 + $0x20] sm:$0xff]   ;;  %v1923_v20 = vld [vmem:[#allocation4 + $0x68] sm:$0xff]   ;;  %v2239_v36 = vsub.s32 %v130_v31, %v2236_v32 }
  0x51   :  { %1718 = vmatpush3.bf16.msra.mxu0 %v1908_v5  ;;  %v1917_v14 = vld [vmem:[#allocation4 + $0xd8] sm:$0xff]   ;;  %v1921_v18 = vld [vmem:[#allocation4 + $0xe0] sm:$0xff]   ;;  %v1924_v21 = vld [vmem:[#allocation4 + $0x28] sm:$0xff]  }
  0x52   :  { %1719 = vmatprep.subr.bf16.mxu0 %v1911_v8  ;;  %v1918_v15 = vld [vmem:[#allocation4 + $0x98] sm:$0xff]   ;;  %v1922_v19 = vld [vmem:[#allocation4 + $0xa0] sm:$0xff]   ;;  %v1925_v22 = vld [vmem:[#allocation4 + $0xe8] sm:$0xff]  }
  0x53   :  { %1740 = vmatpush3.bf16.msra.mxu1 %v1910_v7  ;;  %v1926_v23 = vld [vmem:[#allocation4 + $0xa8] sm:$0xff]   ;;  %v1927_v27 = vld [vmem:[#allocation4 + $0x70] sm:$0xff]   ;;  %v1931_v33 = vld [vmem:[#allocation4 + $0x78] sm:$0xff]  }
  0x54   :  { %1741 = vmatprep.subr.bf16.mxu1 %v1913_v10  ;;  %v1928_v28 = vld [vmem:[#allocation4 + $0x30] sm:$0xff]   ;;  %v1932_v34 = vld [vmem:[#allocation4 + $0x38] sm:$0xff]   ;;  %v1943_v46 = vld [vmem:[#allocation4 + $0x140] sm:$0xff]  }
  0x55   :  { %1720 = vmatpush3.bf16.msra.mxu0 %v1912_v9  ;;  %v1929_v29 = vld [vmem:[#allocation4 + $0xf0] sm:$0xff]   ;;  %v1933_v35 = vld [vmem:[#allocation4 + $0xf8] sm:$0xff]   ;;  %v1946_v49 = vld [vmem:[#allocation2 + $0x5c] ss:$22 sps:$4 sm:$0xff]  }
  0x56   :  { %1721 = vmatprep.subr.bf16.mxu0 %v1915_v12  ;;  %v1930_v30 = vld [vmem:[#allocation4 + $0xb0] sm:$0xff]   ;;  %v1938_v39 = vld [vmem:[#allocation2 + $0x58] ss:$22 sps:$4 sm:$0xff]   ;;  %v248_v57 = vrot.slane %v1946_v49, %v2239_v36 }
  0x57   :  { %1742 = vmatpush3.bf16.msra.mxu1 %v1914_v11  ;;  %v1934_v37 = vld [vmem:[#allocation2] ss:$22 sps:$4 sm:$0xff]   ;;  %v1940_v40 = vld [vmem:[#allocation2 + $0x84] ss:$22 sps:$4 sm:$0xff]   ;;  %v1942_v42 = vld [vmem:[#allocation4 + $0xb8] sm:$0xff]   ;;  %v241_v44 = vrot.slane %v1938_v39, %v2239_v36 }
  0x58   :  { %1743 = vmatprep.subr.bf16.mxu1 %v1917_v14  ;;  %v1936_v38 = vld [vmem:[#allocation2 + $0x2c] ss:$22 sps:$4 sm:$0xff]   ;;  %v134_v41 = vrot.slane %v1934_v37, %v2239_v36  ;;  %v255_v45 = vrot.slane %v1940_v40, %v2239_v36  ;;  %v1945_v48 = vld [vmem:[#allocation2 + $0x30] ss:$22 sps:$4 sm:$0xff]   ;;  %v1951_v3 = vld [vmem:[#allocation4 + $0x148] sm:$0xff]  }
  0x59   :  { %1722 = vmatpush3.bf16.msra.mxu0 %v1916_v13  ;;  %v148_v43 = vrot.slane %v1936_v38, %v2239_v36  ;;  %v1944_v47 = vld [vmem:[#allocation2 + $0x4] ss:$22 sps:$4 sm:$0xff]   ;;  %v1947_v54 = vld [vmem:[#allocation2 + $0x88] ss:$22 sps:$4 sm:$0xff]   ;;  %v155_v56 = vrot.slane %v1945_v48, %v2239_v36  ;;  %v1948_v58 = vld [vmem:[#allocation4 + $0x100] sm:$0xff]  }
  0x5a   :  { %1723 = vmatprep.subr.bf16.mxu0 %v1919_v16  ;;  %v264_v51 = vcombine.high %v241_v44, %v255_v45  ;;  %v263_v53 = vcombine.low %v241_v44, %v255_v45  ;;  %v141_v55 = vrot.slane %v1944_v47, %v2239_v36  ;;  %v262_v61 = vrot.slane %v1947_v54, %v2239_v36  ;;  %v1949_v62 = vld [vmem:[#allocation4 + $0x1c0] sm:$0xff]   ;;  %v1952_v7 = vld [vmem:[#allocation4 + $0x108] sm:$0xff]   ;;  %v1955_v9 = vld [vmem:[#allocation4 + $0x150] sm:$0xff]  }
  0x5b   :  { %1744 = vmatpush3.bf16.msra.mxu1 %v1918_v15  ;;  %v157_v50 = vcombine.high %v134_v41, %v148_v43  ;;  %v156_v52 = vcombine.low %v134_v41, %v148_v43  ;;  %v1950_v4 = vld [vmem:[#allocation4 + $0x180] sm:$0xff]   ;;  %v1953_v8 = vld [vmem:[#allocation4 + $0x1c8] sm:$0xff]   ;;  %v1956_v11 = vld [vmem:[#allocation4 + $0x110] sm:$0xff]  }
  0x5c   :  { %1745 = vmatprep.subr.bf16.mxu1 %v1921_v18  ;;  %v159_v63 = vcombine.high %v141_v55, %v155_v56  ;;  %v158_v0 = vcombine.low %v141_v55, %v155_v56  ;;  %v266_v1 = vcombine.high %v248_v57, %v262_v61  ;;  %v265_v2 = vcombine.low %v248_v57, %v262_v61  ;;  %v1954_v10 = vld [vmem:[#allocation4 + $0x188] sm:$0xff]   ;;  %v1957_v12 = vld [vmem:[#allocation4 + $0x1d0] sm:$0xff]   ;;  %v1959_v13 = vld [vmem:[#allocation4 + $0x158] sm:$0xff]  }
  0x5d   :  { %1724 = vmatpush3.bf16.msra.mxu0 %v1920_v17  ;;  %v361_v59 = vpack.c.bf16 %v264_v51, %v157_v50  ;;  %v360_v60 = vpack.c.bf16 %v263_v53, %v156_v52  ;;  %v1958_v14 = vld [vmem:[#allocation4 + $0x190] sm:$0xff]   ;;  %v1960_v15 = vld [vmem:[#allocation4 + $0x118] sm:$0xff]   ;;  %v1963_v17 = vld [vmem:[#allocation4 + $0x160] sm:$0xff]   ;;  %v2139_v57 = vmov 0.0  }
  0x5e   :  { %1725 = vmatprep.subr.bf16.mxu0 %v1923_v20  ;;  %v363_v5 = vpack.c.bf16 %v266_v1, %v159_v63  ;;  %v362_v6 = vpack.c.bf16 %v265_v2, %v158_v0  ;;  %v1961_v16 = vld [vmem:[#allocation4 + $0x1d8] sm:$0xff]   ;;  %v1965_v20 = vld [vmem:[#allocation4 + $0x1e0] sm:$0xff]   ;;  %v1969_v24 = vld [vmem:[#allocation4 + $0x1e8] sm:$0xff]  }
  0x5f   :  { %1746 = vmatpush3.bf16.msra.mxu1 %v1922_v19  ;;  %1062 = vmatprep.mubr.bf16.mxu0 %v361_v59  ;;  %v1962_v18 = vld [vmem:[#allocation4 + $0x198] sm:$0xff]   ;;  %v1964_v19 = vld [vmem:[#allocation4 + $0x120] sm:$0xff]   ;;  %v1971_v25 = vld [vmem:[#allocation4 + $0x170] sm:$0xff]  }
  0x60   :  { %1747 = vmatprep.subr.bf16.mxu1 %v1925_v22  ;;  %1103 = vmatprep.mubr.bf16.mxu1 %v363_v5  ;;  %v1966_v22 = vld [vmem:[#allocation4 + $0x1a0] sm:$0xff]   ;;  %v1970_v26 = vld [vmem:[#allocation4 + $0x1a8] sm:$0xff]   ;;  %v1976_v31 = vld [vmem:[#allocation4 + $0x138] sm:$0xff]  }
  0x61   :  { %1726 = vmatpush3.bf16.msra.mxu0 %v1924_v21  ;;  %v1967_v21 = vld [vmem:[#allocation4 + $0x168] sm:$0xff]   ;;  %v1984_v38 = vld [vmem:[#allocation2 + $0x8c] ss:$22 sps:$4 sm:$0xff]   ;;  %v1987_v44 = vld [vmem:[#allocation4 + $0x240] sm:$0xff]  }
  0x62   :  { %1727 = vmatprep.subr.bf16.mxu0 %v1927_v27  ;;  %v1972_v27 = vld [vmem:[#allocation4 + $0x130] sm:$0xff]   ;;  %v291_v43 = vrot.slane %v1984_v38, %v2239_v36  ;;  %v1993_v1 = vld [vmem:[#allocation4 + $0x248] sm:$0xff]  }
  0x63   :  { %1748 = vmatpush3.bf16.msra.mxu1 %v1926_v23  ;;  %v1968_v23 = vld [vmem:[#allocation4 + $0x128] sm:$0xff]   ;;  %v1988_v45 = vld [vmem:[#allocation2 + $0xc] ss:$22 sps:$4 sm:$0xff]   ;;  %v1991_v50 = vld [vmem:[#allocation2 + $0x90] ss:$22 sps:$4 sm:$0xff]  }
  0x64   :  { %1749 = vmatprep.subr.bf16.mxu1 %v1929_v29  ;;  %v1974_v29 = vld [vmem:[#allocation4 + $0x1b0] sm:$0xff]   ;;  %v177_v53 = vrot.slane %v1988_v45, %v2239_v36  ;;  %v298_v56 = vrot.slane %v1991_v50, %v2239_v36  ;;  %v2026_v50 = vld [vmem:[#allocation6 + $0x30] sm:$0xff]  }
  0x65   :  { %1728 = vmatpush3.bf16.msra.mxu0 %v1928_v28  ;;  %v1973_v28 = vld [vmem:[#allocation4 + $0x1f0] sm:$0xff]  }
  0x66   :  { %1729 = vmatprep.subr.bf16.mxu0 %v1931_v33  ;;  %v1977_v33 = vld [vmem:[#allocation4 + $0x1f8] sm:$0xff]   ;;  %v1982_v37 = vld [vmem:[#allocation2 + $0x60] ss:$22 sps:$4 sm:$0xff]   ;;  %v1990_v49 = vld [vmem:[#allocation2 + $0x64] ss:$22 sps:$4 sm:$0xff]  }
  0x67   :  { %1750 = vmatpush3.bf16.msra.mxu1 %v1930_v30  ;;  %v1975_v30 = vld [vmem:[#allocation4 + $0x178] sm:$0xff]   ;;  %v277_v41 = vrot.slane %v1982_v37, %v2239_v36  ;;  %v284_v55 = vrot.slane %v1990_v49, %v2239_v36  ;;  %v1995_v5 = vld [vmem:[#allocation4 + $0x250] sm:$0xff]  }
  0x68   :  { %1751 = vmatprep.subr.bf16.mxu1 %v1933_v35  ;;  %v1980_v35 = vld [vmem:[#allocation2 + $0x34] ss:$22 sps:$4 sm:$0xff]   ;;  %v2021_v45 = vld [vmem:[#allocation6 + $0x8] sm:$0xff]  }
  0x69   :  { %1730 = vmatpush3.bf16.msra.mxu0 %v1932_v34  ;;  %v1978_v34 = vld [vmem:[#allocation2 + $0x8] ss:$22 sps:$4 sm:$0xff]   ;;  %v184_v40 = vrot.slane %v1980_v35, %v2239_v36  ;;  %v300_v51 = vcombine.high %v277_v41, %v291_v43  ;;  %v299_v52 = vcombine.low %v277_v41, %v291_v43  ;;  %v301_v0 = vcombine.low %v284_v55, %v298_v56 }
  0x6a   :  { %1759 = vmatprep.subr.bf16.mxu0 %v1943_v46  ;;  %v170_v39 = vrot.slane %v1978_v34, %v2239_v36  ;;  %v1989_v46 = vld [vmem:[#allocation2 + $0x38] ss:$22 sps:$4 sm:$0xff]   ;;  %v2004_v34 = vld [vmem:[#allocation4 + $0x230] sm:$0xff]  }
  0x6b   :  { %1752 = vmatpush3.bf16.msra.mxu1 %v1942_v42  ;;  %v1986_v42 = vld [vmem:[#allocation4 + $0x1b8] sm:$0xff]   ;;  %v191_v54 = vrot.slane %v1989_v46, %v2239_v36  ;;  %v2025_v49 = vld [vmem:[#allocation6 + $0x28] sm:$0xff]  }
  0x6c   :  { %1781 = vmatprep.subr.bf16.mxu1 %v1949_v62  ;;  %1063 = vmatmul.mubr.bf16.vlgmr.msra.gmra.mrb[0].mxu0 %v360_v60  ;;  %v193_v47 = vcombine.high %v170_v39, %v184_v40  ;;  %v192_v48 = vcombine.low %v170_v39, %v184_v40  ;;  %v1992_v60 = vld [vmem:[#allocation4 + $0x200] sm:$0xff]   ;;  %v302_v62 = vcombine.high %v284_v55, %v298_v56  ;;  %v2005_v35 = vld [vmem:[#allocation4 + $0x278] sm:$0xff]   ;;  %v2032_v56 = vld [vmem:[#allocation7 + $0x20] sm:$0xff]  }
  0x6d   :  { %1760 = vmatpush3.bf16.msra.mxu0 %v1948_v58  ;;  %v195_v61 = vcombine.high %v177_v53, %v191_v54  ;;  %v194_v63 = vcombine.low %v177_v53, %v191_v54  ;;  %v2006_v41 = vld [vmem:[#allocation4 + $0x238] sm:$0xff]   ;;  %v2029_v53 = vld [vmem:[#allocation7 + $0x8] sm:$0xff]   ;;  %v2031_v55 = vld [vmem:[#allocation7 + $0x18] sm:$0xff]  }
  0x6e   :  { %1761 = vmatprep.subr.bf16.mxu0 %v1951_v3  ;;  %1104 = vmatmul.mubr.bf16.vlgmr.msra.gmra.mrb[0].mxu1 %v362_v6  ;;  %v365_v58 = vpack.c.bf16 %v300_v51, %v193_v47  ;;  %v364_v59 = vpack.c.bf16 %v299_v52, %v192_v48  ;;  %v1996_v6 = vld [vmem:[#allocation4 + $0x210] sm:$0xff]   ;;  %v2022_v46 = vld [vmem:[#allocation6 + $0x10] sm:$0xff]   ;;  %v2023_v47 = vld [vmem:[#allocation6 + $0x18] sm:$0xff]  }
  0x6f   :  { %1782 = vmatpush3.bf16.msra.mxu1 %v1950_v4  ;;  %v367_v2 = vpack.c.bf16 %v302_v62, %v195_v61  ;;  %v366_v3 = vpack.c.bf16 %v301_v0, %v194_v63  ;;  %v1994_v4 = vld [vmem:[#allocation4 + $0x208] sm:$0xff]   ;;  %v2027_v51 = vld [vmem:[#allocation6 + $0x38] sm:$0xff]   ;;  %v2030_v54 = vld [vmem:[#allocation7 + $0x10] sm:$0xff]  }
  0x70   :  { %1783 = vmatprep.subr.bf16.mxu1 %v1953_v8  ;;  %1144 = vmatprep.mubr.bf16.mxu0 %v365_v58  ;;  %v1998_v8 = vld [vmem:[#allocation4 + $0x218] sm:$0xff]   ;;  %v2024_v48 = vld [vmem:[#allocation6 + $0x20] sm:$0xff]   ;;  %v2033_v58 = vld [vmem:[#allocation7 + $0x28] sm:$0xff]  }
  0x71   :  { %1762 = vmatpush3.bf16.msra.mxu0 %v1952_v7  ;;  %1185 = vmatprep.mubr.bf16.mxu1 %v367_v2  ;;  %v1997_v7 = vld [vmem:[#allocation4 + $0x258] sm:$0xff]   ;;  %v2028_v52 = vld [vmem:[#allocation7] sm:$0xff]  }
  0x72   :  { %1763 = vmatprep.subr.bf16.mxu0 %v1955_v9  ;;  %v1999_v9 = vld [vmem:[#allocation4 + $0x260] sm:$0xff]  }
  0x73   :  { %1784 = vmatpush3.bf16.msra.mxu1 %v1954_v10  ;;  %v2007_v10 = vld [vmem:[#allocation4 + $0x280] sm:$0xff]  }
  0x74   :  { %1785 = vmatprep.subr.bf16.mxu1 %v1957_v12  ;;  %v2001_v12 = vld [vmem:[#allocation4 + $0x268] sm:$0xff]  }
  0x75   :  { %1764 = vmatpush3.bf16.msra.mxu0 %v1956_v11  ;;  %v2000_v11 = vld [vmem:[#allocation4 + $0x220] sm:$0xff]  }
  0x76   :  { %1765 = vmatprep.subr.bf16.mxu0 %v1959_v13  ;;  %v2008_v13 = vld [vmem:[#allocation2 + $0x10] ss:$22 sps:$4 sm:$0xff]  }
  0x77   :  { %1786 = vmatpush3.bf16.msra.mxu1 %v1958_v14  ;;  %v2011_v14 = vld [vmem:[#allocation2 + $0x3c] ss:$22 sps:$4 sm:$0xff]  }
  0x78   :  { %1787 = vmatprep.subr.bf16.mxu1 %v1961_v16  ;;  %v2013_v16 = vld [vmem:[#allocation2 + $0x40] ss:$22 sps:$4 sm:$0x33]  }
  0x79   :  { %1766 = vmatpush3.bf16.msra.mxu0 %v1960_v15  ;;  %v2010_v15 = vld [vmem:[#allocation2 + $0x14] ss:$22 sps:$4 sm:$0x33]  }
  0x7a   :  { %1767 = vmatprep.subr.bf16.mxu0 %v1963_v17  ;;  %v2002_v17 = vld [vmem:[#allocation4 + $0x228] sm:$0xff]  }
  0x7b   :  { %1788 = vmatpush3.bf16.msra.mxu1 %v1962_v18  ;;  %v206_v18 = vrot.slane %v2008_v13, %v2239_v36 }
  0x7c   :  { %1789 = vmatprep.subr.bf16.mxu1 %v1965_v20  ;;  %v2014_v20 = vld [vmem:[#allocation2 + $0x68] ss:$22 sps:$4 sm:$0xff]  }
  0x7d   :  { %1768 = vmatpush3.bf16.msra.mxu0 %v1964_v19  ;;  %v220_v19 = vrot.slane %v2011_v14, %v2239_v36 }
  0x7e   :  { %1769 = vmatprep.subr.bf16.mxu0 %v1967_v21  ;;  %v2016_v21 = vld [vmem:[#allocation2 + $0x6c] ss:$22 sps:$4 sm:$0x33]  }
  0x7f   :  { %1790 = vmatpush3.bf16.msra.mxu1 %v1966_v22  ;;  %v2003_v22 = vld [vmem:[#allocation4 + $0x270] sm:$0xff]  }
  0x80   :  { %1791 = vmatprep.subr.bf16.mxu1 %v1969_v24  ;;  %v227_v24 = vrot.slane %v2013_v16, %v2239_v36 }
  0x81   :  { %1770 = vmatpush3.bf16.msra.mxu0 %v1968_v23  ;;  %v213_v23 = vrot.slane %v2010_v15, %v2239_v36 }
  0x82   :  { %1771 = vmatprep.subr.bf16.mxu0 %v1971_v25  ;;  %v2017_v25 = vld [vmem:[#allocation2 + $0x94] ss:$22 sps:$4 sm:$0xff]  }
  0x83   :  { %1792 = vmatpush3.bf16.msra.mxu1 %v1970_v26  ;;  %v2019_v26 = vld [vmem:[#allocation2 + $0x98] ss:$22 sps:$4 sm:$0x33]  }
  0x84   :  { %1793 = vmatprep.subr.bf16.mxu1 %v1973_v28  ;;  %v320_v28 = vrot.slane %v2016_v21, %v2239_v36 }
  0x85   :  { %1772 = vmatpush3.bf16.msra.mxu0 %v1972_v27  ;;  %v313_v27 = vrot.slane %v2014_v20, %v2239_v36 }
  0x86   :  { %1773 = vmatprep.subr.bf16.mxu0 %v1975_v30  ;;  %v327_v30 = vrot.slane %v2017_v25, %v2239_v36 }
  0x87   :  { %1794 = vmatpush3.bf16.msra.mxu1 %v1974_v29  ;;  %v229_v29 = vcombine.high %v206_v18, %v220_v19 }
  0x88   :  { %1795 = vmatprep.subr.bf16.mxu1 %v1977_v33  ;;  %v230_v33 = vcombine.low %v213_v23, %v227_v24  ;;  %v336_v37 = vcombine.high %v313_v27, %v327_v30  ;;  %v335_v43 = vcombine.low %v313_v27, %v327_v30 }
  0x89   :  { %1774 = vmatpush3.bf16.msra.mxu0 %v1976_v31  ;;  %v334_v31 = vrot.slane %v2019_v26, %v2239_v36 }
  0x8a   :  { %1803 = vmatprep.subr.bf16.mxu0 %v1987_v44  ;;  %v369_v39 = vpack.c.bf16 %v336_v37, %v229_v29  ;;  %v2020_v44 = vld [vmem:[#allocation6] sm:$0xff]  }
  0x8b   :  { %1796 = vmatpush3.bf16.msra.mxu1 %v1986_v42  ;;  %v337_v38 = vcombine.low %v320_v28, %v334_v31  ;;  %v228_v42 = vcombine.low %v206_v18, %v220_v19 }
  0x8c   :  { %1845 = vmatprep.subr.bf16.mxu1 %v2139_v57  ;;  %1145 = vmatmul.mubr.bf16.vlgmr.msra.gmra.mrb[4].mxu0 %v364_v59 }
  0x8d   :  { %1804 = vmatpush3.bf16.msra.mxu0 %v1992_v60  ;;  %v370_v40 = vpack.c.bf16 %v337_v38, %v230_v33  ;;  %1226 = vmatprep.mubr.bf16.mxu0 %v369_v39  ;;  %v368_v36 = vpack.c.bf16 %v335_v43, %v228_v42  ;;  %v1609_v60 = vld [vmem:[%s2306_s4] ss:$0 sm:$0xff] }
  0x8e   :  { %1805 = vmatprep.subr.bf16.mxu0 %v1993_v1  ;;  %1186 = vmatmul.mubr.bf16.vlgmr.msra.gmra.mrb[4].mxu1 %v366_v3 }
  0x8f   :  { %1847 = vmatprep.mubr.msk.bf16.mxu1 %vm2140_vm0, %v2139_v57  ;;  %1846 = vmatpush3.bf16.msra.mxu1 %v2007_v10 }
  0x90   :  { %1851 = vmatprep.subr.bf16.mxu1 %v2139_v57 }
  0x91   :  { %1806 = vmatpush3.bf16.msra.mxu0 %v1994_v4 }
  0x92   :  { %1807 = vmatprep.subr.bf16.mxu0 %v1995_v5 }
  0x95   :  { %1808 = vmatpush3.bf16.msra.mxu0 %v1996_v6 }
  0x96   :  { %1809 = vmatprep.subr.bf16.mxu0 %v1997_v7  ;;  %1848 = vmatmul.mubr.msk.bf16.vlgmr.msra.gmra.mrb[8].mxu1 %vm1026_vm1, %v370_v40 }
  0x97   :  { %1867 = vmatprep.mubr.msk.bf16.mxu1 %vm2140_vm0, %v2139_v57  ;;  %1852 = vmatpush3.bf16.msra.mxu1 %v2020_v44 }
  0x98   :  { %1853 = vmatprep.subr.bf16.mxu1 %v2139_v57 }
  0x99   :  { %1810 = vmatpush3.bf16.msra.mxu0 %v1998_v8 }
  0x9a   :  { %1811 = vmatprep.subr.bf16.mxu0 %v1999_v9 }
  0x9b   :  { %1854 = vmatpush3.bf16.msra.mxu1 %v2021_v45 }
  0x9c   :  { %1855 = vmatprep.subr.bf16.mxu1 %v2139_v57 }
  0x9d   :  { %1812 = vmatpush3.bf16.msra.mxu0 %v2000_v11 }
  0x9e   :  { %1813 = vmatprep.subr.bf16.mxu0 %v2001_v12 }
  0x9f   :  { %1856 = vmatpush3.bf16.msra.mxu1 %v2022_v46  ;;  %v2034_v46 = vld [vmem:[#allocation7 + $0x30] sm:$0xff]  }
  0xa0   :  { %1857 = vmatprep.subr.bf16.mxu1 %v2139_v57 }
  0xa1   :  { %1814 = vmatpush3.bf16.msra.mxu0 %v2002_v17 }
  0xa2   :  { %1815 = vmatprep.subr.bf16.mxu0 %v2003_v22 }
  0xa3   :  { %1858 = vmatpush3.bf16.msra.mxu1 %v2023_v47  ;;  %v2035_v47 = vld [vmem:[#allocation7 + $0x38] sm:$0xff]  }
  0xa4   :  { %1859 = vmatprep.subr.bf16.mxu1 %v2139_v57 }
  0xa5   :  { %1816 = vmatpush3.bf16.msra.mxu0 %v2004_v34 }
  0xa6   :  { %1817 = vmatprep.subr.bf16.mxu0 %v2005_v35 }
  0xa7   :  { %1860 = vmatpush3.bf16.msra.mxu1 %v2024_v48  ;;  %v1692_v48 = vld [vmem:[%s2306_s4 + $0x1] ss:$0 sm:$0xff] }
  0xa8   :  { %1861 = vmatprep.subr.bf16.mxu1 %v2139_v57 }
  0xa9   :  { %1818 = vmatpush3.bf16.msra.mxu0 %v2006_v41 }
  0xaa   :  { %1871 = vmatprep.subr.bf16.mxu0 %v2139_v57 }
  0xab   :  { %1862 = vmatpush3.bf16.msra.mxu1 %v2025_v49 }
  0xac   :  { %1227 = vmatmul.mubr.bf16.vlgmr.msra.gmra.mrb[8].mxu0 %v368_v36  ;;  %1863 = vmatprep.subr.bf16.mxu1 %v2139_v57 }
  0xad   :  { %1887 = vmatprep.mubr.msk.bf16.mxu0 %vm2140_vm0, %v2139_v57  ;;  %1872 = vmatpush3.bf16.msra.mxu0 %v2028_v52 }
  0xae   :  { %1873 = vmatprep.subr.bf16.mxu0 %v2139_v57 }
  0xaf   :  { %1864 = vmatpush3.bf16.msra.mxu1 %v2026_v50 }
  0xb0   :  { %1865 = vmatprep.subr.bf16.mxu1 %v2139_v57 }
  0xb1   :  { %1874 = vmatpush3.bf16.msra.mxu0 %v2029_v53 }
  0xb2   :  { %1875 = vmatprep.subr.bf16.mxu0 %v2139_v57 }
  0xb3   :  { %1866 = vmatpush3.bf16.msra.mxu1 %v2027_v51 }
  0xb5   :  { %1876 = vmatpush3.bf16.msra.mxu0 %v2030_v54 }
  0xb6   :  { %1877 = vmatprep.subr.bf16.mxu0 %v2139_v57 }
  0xb9   :  { %1878 = vmatpush3.bf16.msra.mxu0 %v2031_v55 }
  0xba   :  { %1879 = vmatprep.subr.bf16.mxu0 %v2139_v57 }
  0xbd   :  { %1880 = vmatpush3.bf16.msra.mxu0 %v2032_v56 }
  0xbe   :  { %1881 = vmatprep.subr.bf16.mxu0 %v2139_v57 }
  0xc1   :  { %1882 = vmatpush3.bf16.msra.mxu0 %v2033_v58 }
  0xc2   :  { %1883 = vmatprep.subr.bf16.mxu0 %v2139_v57 }
  0xc5   :  { %1884 = vmatpush3.bf16.msra.mxu0 %v2034_v46 }
  0xc6   :  { %1885 = vmatprep.subr.bf16.mxu0 %v2139_v57  ;;  %v1701_v57 = vld [vmem:[%s2306_s4 + $0x2] ss:$0 sm:$0xff] }
  0xc9   :  { %1886 = vmatpush3.bf16.msra.mxu0 %v2035_v47 }
 0x13f   :  { %v1731_v59 = vpop.f32.mrb[0].mxu0 }
 0x140   :  { %v1732_v61 = vpop.f32.mrb[1].mxu0 }
 0x141   :  { %v1733_v62 = vadd.f32 %v1732_v61, %v1731_v59  ;;  %v1734_v63 = vpop.f32.mrb[2].mxu0  ;;  %v1753_v2 = vpop.f32.mrb[0].mxu1  ;;  %v2141_v59 = vmov 1966171168  }
 0x142   :  { %v1735_v0 = vpop.f32.mrb[3].mxu0  ;;  %v1754_v4 = vpop.f32.mrb[1].mxu1 }
 0x143   :  { %v1065_v1 = vadd.f32 %v1733_v62, %v1609_v60  ;;  %v1736_v3 = vadd.f32 %v1735_v0, %v1734_v63  ;;  %v1755_v6 = vadd.f32 %v1754_v4, %v1753_v2  ;;  %v1756_v7 = vpop.f32.mrb[2].mxu1 }
 0x144   :  { %v1757_v8 = vpop.f32.mrb[3].mxu1 }
 0x145   :  { %v1068_v5 = vadd.f32 %v1736_v3, %v1609_v60  ;;  %v1106_v9 = vadd.f32 %v1755_v6, %v1065_v1  ;;  %v1758_v10 = vadd.f32 %v1757_v8, %v1756_v7  ;;  %v1504_v60 = vunpack.c.l.s4 %v2141_v59 }
 0x147   :  { %v1109_v11 = vadd.f32 %v1758_v10, %v1068_v5  ;;  %v1505_v61 = vunpack.c.0.s8 %v1504_v60 }
 0x149   :  { %v1508_v3 = vsub.s32 %v1505_v61, %v2236_v32 }
 0x15f   :  { %v1775_v12 = vpop.f32.mrb[4].mxu0 }
 0x160   :  { %v1776_v13 = vpop.f32.mrb[5].mxu0 }
 0x161   :  { %v1777_v14 = vadd.f32 %v1776_v13, %v1775_v12  ;;  %v1778_v15 = vpop.f32.mrb[6].mxu0  ;;  %v1797_v16 = vpop.f32.mrb[4].mxu1 }
 0x162   :  { %v1779_v17 = vpop.f32.mrb[7].mxu0  ;;  %v1798_v20 = vpop.f32.mrb[5].mxu1 }
 0x163   :  { %v1147_v18 = vadd.f32 %v1777_v14, %v1106_v9  ;;  %v1780_v19 = vadd.f32 %v1779_v17, %v1778_v15  ;;  %v1799_v21 = vadd.f32 %v1798_v20, %v1797_v16  ;;  %v1800_v22 = vpop.f32.mrb[6].mxu1 }
 0x164   :  { %v1801_v24 = vpop.f32.mrb[7].mxu1 }
 0x165   :  { %v1150_v23 = vadd.f32 %v1780_v19, %v1109_v11  ;;  %v1188_v25 = vadd.f32 %v1799_v21, %v1147_v18  ;;  %v1802_v26 = vadd.f32 %v1801_v24, %v1800_v22 }
 0x167   :  { %v1191_v27 = vadd.f32 %v1802_v26, %v1150_v23 }
 0x169   :  { %v1269_v28 = vpop.f32.mrb[8].mxu1 }
 0x16a   :  { %v1849_v29 = vpop.f32.mrb[9].mxu1 }
 0x16b   :  { %v1272_v30 = vpop.f32.mrb[10].mxu1 }
 0x16c   :  { %v1850_v31 = vpop.f32.mrb[11].mxu1 }
 0x17f   :  { %v1819_v33 = vpop.f32.mrb[8].mxu0 }
 0x180   :  { %v1820_v34 = vpop.f32.mrb[9].mxu0 }
 0x181   :  { %v1821_v35 = vadd.f32 %v1820_v34, %v1819_v33  ;;  %v1822_v37 = vpop.f32.mrb[10].mxu0 }
 0x182   :  { %v1823_v38 = vpop.f32.mrb[11].mxu0 }
 0x183   :  { %v1229_v39 = vadd.f32 %v1821_v35, %v1188_v25  ;;  %v1824_v40 = vadd.f32 %v1823_v38, %v1822_v37 }
 0x185   :  { %v1270_v41 = vadd.f32 %v1269_v28, %v1229_v39  ;;  %v1232_v42 = vadd.f32 %v1824_v40, %v1191_v27 }
 0x187   :  { %v1273_v43 = vadd.f32 %v1272_v30, %v1232_v42  ;;  %v1276_v36 = vmax.f32 %v1270_v41, 0.0 }
 0x189   :  { %v1277_v44 = vmax.f32 %v1273_v43, 0.0 }
 0x18b   :  { %v1278_v45 = vpack.c.bf16 %v1277_v44, %v1276_v36 }
 0x18d   :  { %1868 = vmatmul.mubr.bf16.vlgmr.msra.gmra.mrb[12].mxu1 %v1278_v45 }
 0x260   :  { %v1381_v49 = vpop.f32.mrb[12].mxu1 }
 0x261   :  { %v1382_v50 = vadd.f32 %v1692_v48, %v1381_v49  ;;  %v1869_v51 = vpop.f32.mrb[13].mxu1 }
 0x262   :  { %v1384_v52 = vpop.f32.mrb[14].mxu1 }
 0x263   :  { %v1385_v53 = vadd.f32 %v1692_v48, %v1384_v52  ;;  %v1870_v54 = vpop.f32.mrb[15].mxu1  ;;  %v1388_v55 = vmax.f32 %v1382_v50, 0.0 }
 0x265   :  { %v1389_v56 = vmax.f32 %v1385_v53, 0.0 }
 0x267   :  { %v1390_v58 = vpack.c.bf16 %v1389_v56, %v1388_v55 }
 0x269   :  { %1888 = vmatmul.mubr.bf16.vlgmr.msra.gmra.mrb[12].mxu0 %v1390_v58 }
 0x33c   :  { %v1493_v62 = vpop.f32.mrb[12].mxu0 }
 0x33d   :  { %v1889_v63 = vpop.f32.mrb[13].mxu0  ;;  %v1494_v1 = vadd.f32 %v1701_v57, %v1493_v62 }
 0x33e   :  { %v1496_v0 = vpop.f32.mrb[14].mxu0 }
 0x33f   :  { %v1497_v2 = vadd.f32 %v1701_v57, %v1496_v0  ;;  %v1890_v4 = vpop.f32.mrb[15].mxu0 }
 0x341   :  { %v1500_v5 = vpack.c.bf16 %v1497_v2, %v1494_v1 }
 0x343   :  { %v1509_v6 = vrot.slane %v1500_v5, %v1508_v3 }
 0x345   :  { %1711 = vst.sshfl [vmem:[#allocation9] sm:$0x1 pattern:$0x73625140] %v1509_v6 }
 0x34c   :  { %v1584_v7 = vld [vmem:[#allocation9] sm:$0x1] }
 0x34d   :  { %1585 = vst [vmem:[%s2307_s5] sm:$0x1] %v1584_v7 }
 0x34e   :  { %1602 = vsyncpa [#allocation3], 1 }
 0x34f   :  { %1603 = vsyncpa [#allocation5], 1 }
 0x350   :  { %1604 = vsyncpa [#allocation8], 1 }

</bundles_post_ra>
